<compile_context>
chip_gen: v7x
topology: tpu7x:2x2x1
jax: 0.10.0
libtpu: 0.0.40
codegen_flags: <defaults>
</compile_context>

<pallas_src>
import math
import functools

import jax
import jax.numpy as jnp
from jax import lax
from jax.experimental import pallas as pl
from jax.experimental.pallas import tpu as pltpu


def _alpha_attention_kernel(x_ref, wq_ref, wk_ref, wv_ref, bq_ref, bk_ref,
                            bv_ref, wo_ref, bo_ref, alpha_ref, o_ref, *,
                            heads: int, seq_len: int, batch_blk: int):
    # x_ref : (R, E) VMEM, R = batch_blk * seq_len     (rows of several batches)
    # wq/wk/wv_ref : (heads, E, hd) VMEM   (scale folded into wq)
    # bq/bk/bv_ref : (heads, 1, hd) VMEM
    # wo_ref : (heads, hd, E) VMEM,  bo_ref : (1, E) VMEM
    # alpha_ref : (1, 1) SMEM scalar
    # o_ref : (R, E) VMEM
    x = x_ref[...]                                   # (R, E)
    S = seq_len

    attn = None
    for h in range(heads):                           # heads is static
        # Projections over ALL rows of the chunk at once (MXU-friendly M).
        q = jnp.dot(x, wq_ref[h], preferred_element_type=jnp.float32) + bq_ref[h]
        k = jnp.dot(x, wk_ref[h], preferred_element_type=jnp.float32) + bk_ref[h]
        v = jnp.dot(x, wv_ref[h], preferred_element_type=jnp.float32) + bv_ref[h]

        # Attention is per-batch: split along the (sublane) row axis only.
        ctx_parts = []
        for b in range(batch_blk):                   # static
            lo = b * S
            qb = q[lo:lo + S]                        # (S, hd)
            kb = k[lo:lo + S]
            vb = v[lo:lo + S]
            # q @ k^T without materializing a transpose: contract head_dim.
            s = lax.dot_general(qb, kb, (((1,), (1,)), ((), ())),
                                preferred_element_type=jnp.float32)   # (S, S)
            s = s - jnp.max(s, axis=-1, keepdims=True)
            p = jnp.exp(s)
            p = p * pl.reciprocal(jnp.sum(p, axis=-1, keepdims=True), approx=True)
            ctx_parts.append(jnp.dot(p, vb, preferred_element_type=jnp.float32))
        ctx = ctx_parts[0] if batch_blk == 1 else jnp.concatenate(ctx_parts, axis=0)

        # Per-head slice of the output projection; accumulate (no lane concat).
        contrib = jnp.dot(ctx, wo_ref[h], preferred_element_type=jnp.float32)
        attn = contrib if attn is None else attn + contrib

    attn = attn + bo_ref[...]                        # (1, E) broadcast
    alpha = alpha_ref[0, 0]
    o_ref[...] = x + alpha * attn


def _choose_batch_block(B: int, S: int, target_rows: int = 256) -> int:
    """Batch elements per grid step: amortize per-step overhead but keep
    >= 2 grid steps (when B >= 2) so both v7x TensorCores get work."""
    bb = max(1, target_rows // max(S, 1))
    bb = min(bb, B // 2) if B >= 2 else min(bb, B)
    bb = max(bb, 1)
    while B % bb:                       # clean division -> no padding path
        bb -= 1
    if (bb * S) % 8 != 0 and bb != B:   # keep the (8, 128) sublane rule
        bb = B
    return bb


def alpha_attention(x, in_proj_weight, in_proj_bias, out_proj_weight,
                    out_proj_bias, alpha, *, heads: int = 1):
    """x: (B, S, E) float32. Returns x + alpha * MHA(x, x, x) (eval mode)."""
    B, S, E = x.shape
    assert E % heads == 0
    hd = E // heads
    scale = 1.0 / math.sqrt(hd)
    f32 = jnp.float32

    # torch convention: in_proj_weight (3E, E), q = x @ Wq.T + bq, etc.
    w_q = in_proj_weight[0 * E:1 * E].astype(f32).T          # (E_in, E_out)
    w_k = in_proj_weight[1 * E:2 * E].astype(f32).T
    w_v = in_proj_weight[2 * E:3 * E].astype(f32).T
    b_q = in_proj_bias[0 * E:1 * E].astype(f32)
    b_k = in_proj_bias[1 * E:2 * E].astype(f32)
    b_v = in_proj_bias[2 * E:3 * E].astype(f32)

    def per_head_w(w):   # (E, E) -> (heads, E, hd)  per-head column slabs
        return w.reshape(E, heads, hd).transpose(1, 0, 2)

    def per_head_b(b):   # (E,) -> (heads, 1, hd)
        return b.reshape(heads, hd)[:, None, :]

    # Fold the 1/sqrt(hd) attention scale into the Q projection (one-time
    # wrapper-side weight transform, not a per-call activation pre-scale).
    wq = per_head_w(w_q) * scale
    bq = per_head_b(b_q) * scale
    wk = per_head_w(w_k)
    bk = per_head_b(b_k)
    wv = per_head_w(w_v)
    bv = per_head_b(b_v)

    # out_proj: attn = ctx @ Wo.T + bo; split the contraction per head so
    # per-head contexts accumulate into (rows, E) without a lane concatenate.
    wo = out_proj_weight.astype(f32).T.reshape(heads, hd, E)  # (heads, hd, E)
    bo = out_proj_bias.astype(f32).reshape(1, E)
    alpha_s = jnp.asarray(alpha, f32).reshape(1, 1)

    # Fold (batch, seq) into the matmul row dimension; grid over batch chunks.
    bb = _choose_batch_block(B, S)
    grid = (B // bb,)
    R = bb * S
    x2d = x.astype(f32).reshape(B * S, E)

    kernel = functools.partial(_alpha_attention_kernel, heads=heads,
                               seq_len=S, batch_blk=bb)

    out2d = pl.pallas_call(
        kernel,
        out_shape=jax.ShapeDtypeStruct((B * S, E), f32),
        grid_spec=pltpu.PrefetchScalarGridSpec(
            num_scalar_prefetch=0,
            grid=grid,
            in_specs=[
                pl.BlockSpec((R, E), lambda i: (i, 0)),             # x rows
                pl.BlockSpec((heads, E, hd), lambda i: (0, 0, 0)),  # W_q (scaled)
                pl.BlockSpec((heads, E, hd), lambda i: (0, 0, 0)),  # W_k
                pl.BlockSpec((heads, E, hd), lambda i: (0, 0, 0)),  # W_v
                pl.BlockSpec((heads, 1, hd), lambda i: (0, 0, 0)),  # b_q (scaled)
                pl.BlockSpec((heads, 1, hd), lambda i: (0, 0, 0)),  # b_k
                pl.BlockSpec((heads, 1, hd), lambda i: (0, 0, 0)),  # b_v
                pl.BlockSpec((heads, hd, E), lambda i: (0, 0, 0)),  # W_out
                pl.BlockSpec((1, E), lambda i: (0, 0)),             # b_out
                pl.BlockSpec(memory_space=pltpu.SMEM),              # alpha
            ],
            out_specs=pl.BlockSpec((R, E), lambda i: (i, 0)),
        ),
        compiler_params=pltpu.CompilerParams(
            dimension_semantics=("parallel",)),
    )(x2d, wq, wk, wv, bq, bk, bv, wo, bo, alpha_s)

    return out2d.reshape(B, S, E)


def _reference(x, in_proj_weight, in_proj_bias, out_proj_weight,
               out_proj_bias, alpha, heads=1):
    """Pure-JAX reference matching torch.nn.MultiheadAttention (eval mode)."""
    B, S, E = x.shape
    hd = E // heads
    qkv = jnp.einsum('bse,fe->bsf', x, in_proj_weight) + in_proj_bias
    q, k, v = qkv[..., :E], qkv[..., E:2 * E], qkv[..., 2 * E:]

    def split(t):  # (B, S, E) -> (B, heads, S, hd)
        return t.reshape(B, S, heads, hd).transpose(0, 2, 1, 3)

    q, k, v = split(q), split(k), split(v)
    s = jnp.einsum('bhqd,bhkd->bhqk', q, k) / math.sqrt(hd)
    p = jax.nn.softmax(s, axis=-1)
    ctx = jnp.einsum('bhqk,bhkd->bhqd', p, v)
    ctx = ctx.transpose(0, 2, 1, 3).reshape(B, S, E)
    out = jnp.einsum('bse,fe->bsf', ctx, out_proj_weight) + out_proj_bias
    return x + alpha * out


def _make_params(key, E):
    k1, k2, k3, k4 = jax.random.split(key, 4)
    in_proj_weight = jax.random.normal(k1, (3 * E, E), jnp.float32) / math.sqrt(E)
    in_proj_bias = jax.random.normal(k2, (3 * E,), jnp.float32) * 0.01
    out_proj_weight = jax.random.normal(k3, (E, E), jnp.float32) / math.sqrt(E)
    out_proj_bias = jax.random.normal(k4, (E,), jnp.float32) * 0.01
    return in_proj_weight, in_proj_bias, out_proj_weight, out_proj_bias


if __name__ == "__main__":
    key = jax.random.PRNGKey(0)
    kx1, kx2, kp1, kp2 = jax.random.split(key, 4)

    # Config 1: module-default usage (heads=1, alpha=1e-16), tight tolerance.
    B, S, E = 2, 8, 32
    x = jax.random.normal(kx1, (B, S, E), dtype=jnp.float32)
    wi, bi, wo_, bo_ = _make_params(kp1, E)

    alpha_tiny = jnp.array([1e-16], jnp.float32)
    out = jax.block_until_ready(
        alpha_attention(x, wi, bi, wo_, bo_, alpha_tiny, heads=1))
    ref = _reference(x, wi, bi, wo_, bo_, alpha_tiny, heads=1)
    assert out.shape == (B, S, E)
    assert jnp.allclose(out, ref, atol=1e-5, rtol=1e-5), "mismatch (alpha tiny)"

    # Config 2: non-trivial alpha exercises the full attention path
    # (looser tolerance: softmax denominator uses the approximate EUP reciprocal).
    alpha_big = jnp.array([0.5], jnp.float32)
    out = jax.block_until_ready(
        alpha_attention(x, wi, bi, wo_, bo_, alpha_big, heads=1))
    ref = _reference(x, wi, bi, wo_, bo_, alpha_big, heads=1)
    assert jnp.allclose(out, ref, atol=2e-2, rtol=2e-2), "mismatch (alpha=0.5)"

    # Config 3: larger batch + heads=2 exercises the folded-row batch chunks
    # (4 batches per grid step) and the per-head accumulate path.
    B2 = 8
    x2 = jax.random.normal(kx2, (B2, S, E), dtype=jnp.float32)
    wi2, bi2, wo2, bo2 = _make_params(kp2, E)
    out2 = jax.block_until_ready(
        alpha_attention(x2, wi2, bi2, wo2, bo2, alpha_big, heads=2))
    ref2 = _reference(x2, wi2, bi2, wo2, bo2, alpha_big, heads=2)
    assert out2.shape == (B2, S, E)
    assert jnp.allclose(out2, ref2, atol=2e-2, rtol=2e-2), "mismatch (heads=2)"

    print("KERNEL_OK")
</pallas_src>

<mosaic_0001>
module attributes {stable_mosaic.version = 11 : i64} {
  func.func @_alpha_attention_kernel(%arg0: i32, %arg1: memref<8x32xf32, #tpu.memory_space<vmem>>, %arg2: memref<1x32x32xf32, #tpu.memory_space<vmem>>, %arg3: memref<1x32x32xf32, #tpu.memory_space<vmem>>, %arg4: memref<1x32x32xf32, #tpu.memory_space<vmem>>, %arg5: memref<1x1x32xf32, #tpu.memory_space<vmem>>, %arg6: memref<1x1x32xf32, #tpu.memory_space<vmem>>, %arg7: memref<1x1x32xf32, #tpu.memory_space<vmem>>, %arg8: memref<1x32x32xf32, #tpu.memory_space<vmem>>, %arg9: memref<1x32xf32, #tpu.memory_space<vmem>>, %arg10: memref<1x1xf32, #tpu.memory_space<smem>>, %arg11: memref<8x32xf32, #tpu.memory_space<vmem>>) attributes {dimension_semantics = [#tpu.dimension_semantics<parallel>], iteration_bounds = array<i64: 2>, scalar_prefetch = 0 : i64, scratch_operands = 0 : i64, tpu.core_type = #tpu.core_type<tc>, window_params = [{transform_indices = @transform_0, window_bounds = array<i64: 8, 32>}, {pipeline_mode = #tpu.pipeline_mode<synchronous>, transform_indices = @transform_1, window_bounds = array<i64: 1, 32, 32>}, {pipeline_mode = #tpu.pipeline_mode<synchronous>, transform_indices = @transform_2, window_bounds = array<i64: 1, 32, 32>}, {pipeline_mode = #tpu.pipeline_mode<synchronous>, transform_indices = @transform_3, window_bounds = array<i64: 1, 32, 32>}, {pipeline_mode = #tpu.pipeline_mode<synchronous>, transform_indices = @transform_4, window_bounds = array<i64: 1, 1, 32>}, {pipeline_mode = #tpu.pipeline_mode<synchronous>, transform_indices = @transform_5, window_bounds = array<i64: 1, 1, 32>}, {pipeline_mode = #tpu.pipeline_mode<synchronous>, transform_indices = @transform_6, window_bounds = array<i64: 1, 1, 32>}, {pipeline_mode = #tpu.pipeline_mode<synchronous>, transform_indices = @transform_7, window_bounds = array<i64: 1, 32, 32>}, {pipeline_mode = #tpu.pipeline_mode<synchronous>, transform_indices = @transform_8, window_bounds = array<i64: 1, 32>}, {transform_indices = @transform_9, window_bounds = array<i64: 1, 1>}, {transform_indices = @transform_10, window_bounds = array<i64: 8, 32>}]} {
    %c0 = arith.constant 0 : index
    %c0_0 = arith.constant 0 : index
    %0 = vector.load %arg1[%c0, %c0_0] : memref<8x32xf32, #tpu.memory_space<vmem>>, vector<8x32xf32>
    %c0_1 = arith.constant 0 : index
    %c0_2 = arith.constant 0 : index
    %c0_3 = arith.constant 0 : index
    %1 = vector.load %arg2[%c0_1, %c0_2, %c0_3] : memref<1x32x32xf32, #tpu.memory_space<vmem>>, vector<1x32x32xf32>
    %2 = vector.shape_cast %1 : vector<1x32x32xf32> to vector<32x32xf32>
    %cst = arith.constant dense<0.000000e+00> : vector<8x32xf32>
    %3 = tpu.matmul %0, %2, %cst {dimension_numbers = #tpu.dot_dimension_numbers<[1], [0], [0], [1], [0, 0, 1, 1], [], []>} : vector<8x32xf32>, vector<32x32xf32>, vector<8x32xf32> -> vector<8x32xf32>
    %c0_4 = arith.constant 0 : index
    %c0_5 = arith.constant 0 : index
    %c0_6 = arith.constant 0 : index
    %4 = vector.load %arg5[%c0_4, %c0_5, %c0_6] : memref<1x1x32xf32, #tpu.memory_space<vmem>>, vector<1x1x32xf32>
    %5 = vector.shape_cast %4 : vector<1x1x32xf32> to vector<1x32xf32>
    %6 = vector.broadcast %5 : vector<1x32xf32> to vector<8x32xf32>
    %7 = arith.addf %3, %6 : vector<8x32xf32>
    %c0_7 = arith.constant 0 : index
    %c0_8 = arith.constant 0 : index
    %c0_9 = arith.constant 0 : index
    %8 = vector.load %arg3[%c0_7, %c0_8, %c0_9] : memref<1x32x32xf32, #tpu.memory_space<vmem>>, vector<1x32x32xf32>
    %9 = vector.shape_cast %8 : vector<1x32x32xf32> to vector<32x32xf32>
    %cst_10 = arith.constant dense<0.000000e+00> : vector<8x32xf32>
    %10 = tpu.matmul %0, %9, %cst_10 {dimension_numbers = #tpu.dot_dimension_numbers<[1], [0], [0], [1], [0, 0, 1, 1], [], []>} : vector<8x32xf32>, vector<32x32xf32>, vector<8x32xf32> -> vector<8x32xf32>
    %c0_11 = arith.constant 0 : index
    %c0_12 = arith.constant 0 : index
    %c0_13 = arith.constant 0 : index
    %11 = vector.load %arg6[%c0_11, %c0_12, %c0_13] : memref<1x1x32xf32, #tpu.memory_space<vmem>>, vector<1x1x32xf32>
    %12 = vector.shape_cast %11 : vector<1x1x32xf32> to vector<1x32xf32>
    %13 = vector.broadcast %12 : vector<1x32xf32> to vector<8x32xf32>
    %14 = arith.addf %10, %13 : vector<8x32xf32>
    %c0_14 = arith.constant 0 : index
    %c0_15 = arith.constant 0 : index
    %c0_16 = arith.constant 0 : index
    %15 = vector.load %arg4[%c0_14, %c0_15, %c0_16] : memref<1x32x32xf32, #tpu.memory_space<vmem>>, vector<1x32x32xf32>
    %16 = vector.shape_cast %15 : vector<1x32x32xf32> to vector<32x32xf32>
    %cst_17 = arith.constant dense<0.000000e+00> : vector<8x32xf32>
    %17 = tpu.matmul %0, %16, %cst_17 {dimension_numbers = #tpu.dot_dimension_numbers<[1], [0], [0], [1], [0, 0, 1, 1], [], []>} : vector<8x32xf32>, vector<32x32xf32>, vector<8x32xf32> -> vector<8x32xf32>
    %c0_18 = arith.constant 0 : index
    %c0_19 = arith.constant 0 : index
    %c0_20 = arith.constant 0 : index
    %18 = vector.load %arg7[%c0_18, %c0_19, %c0_20] : memref<1x1x32xf32, #tpu.memory_space<vmem>>, vector<1x1x32xf32>
    %19 = vector.shape_cast %18 : vector<1x1x32xf32> to vector<1x32xf32>
    %20 = vector.broadcast %19 : vector<1x32xf32> to vector<8x32xf32>
    %21 = arith.addf %17, %20 : vector<8x32xf32>
    %cst_21 = arith.constant dense<0.000000e+00> : vector<8x8xf32>
    %22 = tpu.matmul %7, %14, %cst_21 {dimension_numbers = #tpu.dot_dimension_numbers<[1], [1], [0], [0], [0, 0, 1, 0], [], []>} : vector<8x32xf32>, vector<8x32xf32>, vector<8x8xf32> -> vector<8x8xf32>
    %cst_22 = arith.constant dense<0xFF800000> : vector<8xf32>
    %23 = vector.multi_reduction <maximumf>, %22, %cst_22 [1] : vector<8x8xf32> to vector<8xf32>
    %24 = vector.shape_cast %23 : vector<8xf32> to vector<8x1xf32>
    %25 = vector.broadcast %24 : vector<8x1xf32> to vector<8x8xf32>
    %26 = arith.subf %22, %25 : vector<8x8xf32>
    %27 = math.exp %26 : vector<8x8xf32>
    %cst_23 = arith.constant dense<0.000000e+00> : vector<8xf32>
    %28 = vector.multi_reduction <add>, %27, %cst_23 [1] : vector<8x8xf32> to vector<8xf32>
    %29 = vector.shape_cast %28 : vector<8xf32> to vector<8x1xf32>
    %30 = tpu.reciprocal %29 {approx = true} : vector<8x1xf32> -> vector<8x1xf32>
    %31 = vector.broadcast %30 : vector<8x1xf32> to vector<8x8xf32>
    %32 = arith.mulf %27, %31 : vector<8x8xf32>
    %cst_24 = arith.constant dense<0.000000e+00> : vector<8x32xf32>
    %33 = tpu.matmul %32, %21, %cst_24 {dimension_numbers = #tpu.dot_dimension_numbers<[1], [0], [0], [1], [0, 0, 1, 1], [], []>} : vector<8x8xf32>, vector<8x32xf32>, vector<8x32xf32> -> vector<8x32xf32>
    %c0_25 = arith.constant 0 : index
    %c0_26 = arith.constant 0 : index
    %c0_27 = arith.constant 0 : index
    %34 = vector.load %arg8[%c0_25, %c0_26, %c0_27] : memref<1x32x32xf32, #tpu.memory_space<vmem>>, vector<1x32x32xf32>
    %35 = vector.shape_cast %34 : vector<1x32x32xf32> to vector<32x32xf32>
    %cst_28 = arith.constant dense<0.000000e+00> : vector<8x32xf32>
    %36 = tpu.matmul %33, %35, %cst_28 {dimension_numbers = #tpu.dot_dimension_numbers<[1], [0], [0], [1], [0, 0, 1, 1], [], []>} : vector<8x32xf32>, vector<32x32xf32>, vector<8x32xf32> -> vector<8x32xf32>
    %c0_29 = arith.constant 0 : index
    %c0_30 = arith.constant 0 : index
    %37 = vector.load %arg9[%c0_29, %c0_30] : memref<1x32xf32, #tpu.memory_space<vmem>>, vector<1x32xf32>
    %38 = vector.broadcast %37 : vector<1x32xf32> to vector<8x32xf32>
    %39 = arith.addf %36, %38 : vector<8x32xf32>
    %c0_31 = arith.constant 0 : index
    %c0_32 = arith.constant 0 : index
    %40 = memref.load %arg10[%c0_31, %c0_32] : memref<1x1xf32, #tpu.memory_space<smem>>
    %41 = vector.broadcast %40 : f32 to vector<8x32xf32>
    %42 = arith.mulf %41, %39 : vector<8x32xf32>
    %43 = arith.addf %0, %42 : vector<8x32xf32>
    %c0_33 = arith.constant 0 : index
    %c0_34 = arith.constant 0 : index
    %44 = vector.load %arg11[%c0_33, %c0_34] : memref<8x32xf32, #tpu.memory_space<vmem>>, vector<8x32xf32>
    tpu.vector_store %arg11[%c0_33, %c0_34], %43 {strides = array<i32>} : memref<8x32xf32, #tpu.memory_space<vmem>>, vector<8x32xf32>,
    return
  }
  func.func @transform_0(%arg0: i32) -> (i32, i32) {
    %c0_i32 = arith.constant 0 : i32
    %c0_i32_0 = arith.constant 0 : i32
    return %arg0, %c0_i32 : i32, i32
  }
  func.func @transform_1(%arg0: i32) -> (i32, i32, i32) {
    %c0_i32 = arith.constant 0 : i32
    %c0_i32_0 = arith.constant 0 : i32
    %c0_i32_1 = arith.constant 0 : i32
    %c0_i32_2 = arith.constant 0 : i32
    return %c0_i32, %c0_i32_0, %c0_i32_1 : i32, i32, i32
  }
  func.func @transform_2(%arg0: i32) -> (i32, i32, i32) {
    %c0_i32 = arith.constant 0 : i32
    %c0_i32_0 = arith.constant 0 : i32
    %c0_i32_1 = arith.constant 0 : i32
    %c0_i32_2 = arith.constant 0 : i32
    return %c0_i32, %c0_i32_0, %c0_i32_1 : i32, i32, i32
  }
  func.func @transform_3(%arg0: i32) -> (i32, i32, i32) {
    %c0_i32 = arith.constant 0 : i32
    %c0_i32_0 = arith.constant 0 : i32
    %c0_i32_1 = arith.constant 0 : i32
    %c0_i32_2 = arith.constant 0 : i32
    return %c0_i32, %c0_i32_0, %c0_i32_1 : i32, i32, i32
  }
  func.func @transform_4(%arg0: i32) -> (i32, i32, i32) {
    %c0_i32 = arith.constant 0 : i32
    %c0_i32_0 = arith.constant 0 : i32
    %c0_i32_1 = arith.constant 0 : i32
    %c0_i32_2 = arith.constant 0 : i32
    return %c0_i32, %c0_i32_0, %c0_i32_1 : i32, i32, i32
  }
  func.func @transform_5(%arg0: i32) -> (i32, i32, i32) {
    %c0_i32 = arith.constant 0 : i32
    %c0_i32_0 = arith.constant 0 : i32
    %c0_i32_1 = arith.constant 0 : i32
    %c0_i32_2 = arith.constant 0 : i32
    return %c0_i32, %c0_i32_0, %c0_i32_1 : i32, i32, i32
  }
  func.func @transform_6(%arg0: i32) -> (i32, i32, i32) {
    %c0_i32 = arith.constant 0 : i32
    %c0_i32_0 = arith.constant 0 : i32
    %c0_i32_1 = arith.constant 0 : i32
    %c0_i32_2 = arith.constant 0 : i32
    return %c0_i32, %c0_i32_0, %c0_i32_1 : i32, i32, i32
  }
  func.func @transform_7(%arg0: i32) -> (i32, i32, i32) {
    %c0_i32 = arith.constant 0 : i32
    %c0_i32_0 = arith.constant 0 : i32
    %c0_i32_1 = arith.constant 0 : i32
    %c0_i32_2 = arith.constant 0 : i32
    return %c0_i32, %c0_i32_0, %c0_i32_1 : i32, i32, i32
  }
  func.func @transform_8(%arg0: i32) -> (i32, i32) {
    %c0_i32 = arith.constant 0 : i32
    %c0_i32_0 = arith.constant 0 : i32
    %c0_i32_1 = arith.constant 0 : i32
    return %c0_i32, %c0_i32_0 : i32, i32
  }
  func.func @transform_9(%arg0: i32) -> (i32, i32) {
    %c0_i32 = arith.constant 0 : i32
    %c0_i32_0 = arith.constant 0 : i32
    %c0_i32_1 = arith.constant 0 : i32
    return %c0_i32, %c0_i32_0 : i32, i32
  }
  func.func @transform_10(%arg0: i32) -> (i32, i32) {
    %c0_i32 = arith.constant 0 : i32
    %c0_i32_0 = arith.constant 0 : i32
    return %arg0, %c0_i32 : i32, i32
  }
}

</mosaic_0001>

<bundles_post_ra>
// kernel: tpu_custom_call.1
= control target key start
LH: loop header
LB: loop body
LE: loop exit
PB: predicated region body
PF: predicated region fallthrough
CT: control target
= control target key end

     0   :  { %s1911_s0 = inlined_call_operand.hbm [shape: f32[16,32], index: 0, kind: input, shape index: {}]   ;;  %s1912_s1 = inlined_call_operand.hbm [shape: f32[1,32,32], index: 1, kind: input, shape index: {}]   ;;  %s1913_s2 = inlined_call_operand.hbm [shape: f32[1,32,32], index: 2, kind: input, shape index: {}]   ;;  %s1914_s3 = inlined_call_operand.hbm [shape: f32[1,32,32], index: 3, kind: input, shape index: {}]   ;;  %s1915_s4 = inlined_call_operand.vmem [shape: f32[1,1,32], index: 4, kind: input, shape index: {}]   ;;  %s1916_s5 = inlined_call_operand.vmem [shape: f32[1,1,32], index: 5, kind: input, shape index: {}]   ;;  %s1917_s6 = inlined_call_operand.vmem [shape: f32[1,1,32], index: 6, kind: input, shape index: {}]   ;;  %s1918_s7 = inlined_call_operand.hbm [shape: f32[1,32,32], index: 7, kind: input, shape index: {}]   ;;  %s1919_s8 = inlined_call_operand.vmem [shape: f32[1,32], index: 8, kind: input, shape index: {}]   ;;  %s1920_s9 = inlined_call_operand.<no memory space> [shape: f32[1,1], index: 9, kind: input, shape index: {}]   ;;  %s1921_s10 = inlined_call_operand.hbm [shape: f32[16,32], index: 10, kind: output, shape index: {}]  }
   0x1   :  { %1926 = sst [smem:[#allocation17_spill]] %s1912_s1 }
   0x2   :  { %1927 = sst [smem:[#allocation18_spill]] %s1921_s10 }
   0x3   :  { %15 = sst [smem:[#allocation2]] %s1920_s9 }
   0x4   :  { %16 = vsyncpa [#allocation4], 0 }
   0x5   :  { %18 = vsyncpa [#allocation4 + $0x1], 0 }
   0x6   :  { %19 = vsyncpa [#allocation7], 0 }
   0x7   :  { %20 = vsyncpa [#allocation10], 0 }
   0x8   :  { %21 = vsyncpa [#allocation5], 0 }
   0x9   :  { %23 = vsyncpa [#allocation5 + $0x1], 0  ;;  %s1570_s15 = smov 0   ;;  %s1572_s16 = smov 0  }
   0xa   :  { %s1574_s17 = smov 0   ;;  %s1576_s18 = smov 0  }
   0xb LB: > { %s1501_s9 = smov [#allocation6]   ;;  %s1591_s20 = sadd.s32 4294967295, %s1499_s18   ;;  %s1499_s18 = sphi %s1576_s18, %s1950_s18   ;;  %s1495_s17 = sphi %s1574_s17, %s1949_s17   ;;  %s1491_s16 = sphi %s1572_s16, %s1948_s16   ;;  %s1487_s15 = sphi %s1570_s15, %s1947_s15  }
   0xc   : > { %s287_s19 = sshll.u32 %s1501_s9, 4  ;;  %p1055_p0 = scmp.ge.s32.totalorder %s1499_s18, 1  ;;  %s1596_s19 = int_to_ptr.vmem [resolvable:$true] %s287_s19 }
   0xd   : > { %p1923_p1 = scmp.eq.s32.totalorder %s1591_s20, 0  ;;  %p275_p2 = scmp.lt.s32.totalorder %s1499_s18, 3 }
   0xe   : > { %s1502_s22 = smov [#allocation9]   ;;  %s1503_s25 = smov [#allocation8]  }
   0xf   : > { %p1598_p3 = pnand %p1055_p0, %p275_p2  ;;  %s313_s23 = sshll.u32 %s1502_s22, 4  ;;  %s1611_s23 = int_to_ptr.vmem [resolvable:$true] %s313_s23 }
  0x10   : > { %s300_s26 = sshll.u32 %s1503_s25, 4  ;;  %s1930_s1 = sld [smem:[#allocation17_spill]]  ;;  %s1613_s26 = int_to_ptr.vmem [resolvable:$true] %s300_s26 }
  0x11   : > { %s1928_s21 = scalar_select %p1598_p3, 1, 0 }
  0x12   : > { %p1207_p5 = pneg %p1598_p3 }
  0x14   : > { %p1607_p6 = pnand %p1207_p5, %p1923_p1 }
  0x16   : > { %s1283_s29 = scalar_lea.hbm %s1930_s1, 512  ;;  %p1623_p8 = pneg %p1607_p6 }
  0x17   : > { %p1284_p7 = scmp.ne.s32.totalorder %s1930_s1, %s1283_s29  ;;  %p1290_p11 = scmp.lt.u32.totalorder %s1283_s29, %s1930_s1 }
  0x19   : > { %p1286_p9 = pnand %p1623_p8, %p1284_p7 }
  0x1b   : > { %p1287_p10 = pneg %p1286_p9 }
  0x1d   : > { %p1292_p12 = pnand %p1290_p11, %p1287_p10 }
  0x1f   : > { %1295 = shalt.err (!%p1292_p12)
}
  0x20   : > { %s1296_s9 = scalar_lea.vmem %s1596_s19, 512  ;;  %p1304_p5 = scmp.lt.s32.totalorder %s1596_s19, %s1596_s19 }
  0x21   : > { %p1297_p13 = scmp.ne.s32.totalorder %s1596_s19, %s1296_s9  ;;  %p1305_p4 = scmp.lt.s32.totalorder %s1296_s9, %s1296_s9 }
  0x23   : > { %p1299_p0 = pnand %p1297_p13, %p1623_p8  ;;  %p1306_p7 = por %p1305_p4, %p1304_p5 }
  0x25   : > { %p1300_p2 = pneg %p1299_p0 }
  0x27   : > { %p1307_p9 = pnand %p1306_p7, %p1300_p2 }
  0x29   : > { %1310 = shalt.err (!%p1307_p9)
}
  0x2a   : > { %s1504_s22 = smov 128   ;;  %s1505_s25 = smov 8  }
  0x2b   : > { %1210 = dma.hbm_to_vmem [thread:$0]  (!%p1607_p6), %s1930_s1, 512, %s1596_s19, [#allocation7], %s1504_s22, %s1504_s22, %s1505_s25  }
  0x2c   : > { %s1311_s11 = scalar_lea.hbm %s1914_s3, 512 }
  0x2d   : > { %p1312_p4 = scmp.ne.s32.totalorder %s1914_s3, %s1311_s11  ;;  %p1318_p12 = scmp.lt.u32.totalorder %s1311_s11, %s1914_s3 }
  0x2f   : > { %p1314_p10 = pnand %p1312_p4, %p1623_p8 }
  0x31   : > { %p1315_p11 = pneg %p1314_p10 }
  0x33   : > { %p1320_p13 = pnand %p1318_p12, %p1315_p11 }
  0x35   : > { %1323 = shalt.err (!%p1320_p13)
}
  0x36   : > { %s1324_s19 = scalar_lea.vmem %s1611_s23, 512  ;;  %p1332_p7 = scmp.lt.s32.totalorder %s1611_s23, %s1611_s23 }
  0x37   : > { %p1325_p0 = scmp.ne.s32.totalorder %s1611_s23, %s1324_s19  ;;  %p1333_p9 = scmp.lt.s32.totalorder %s1324_s19, %s1324_s19 }
  0x39   : > { %p1327_p2 = pnand %p1325_p0, %p1623_p8  ;;  %p1334_p4 = por %p1333_p9, %p1332_p7 }
  0x3b   : > { %p1328_p5 = pneg %p1327_p2 }
  0x3d   : > { %p1335_p10 = pnand %p1334_p4, %p1328_p5 }
  0x3f   : > { %1338 = shalt.err (!%p1335_p10)
}
  0x40   : > { %1216 = dma.hbm_to_vmem [thread:$0]  (!%p1607_p6), %s1914_s3, 512, %s1611_s23, [#allocation10], %s1504_s22, %s1504_s22, %s1505_s25  }
  0x41   : > { %s1339_s30 = scalar_lea.hbm %s1913_s2, 512 }
  0x42   : > { %p1340_p11 = scmp.ne.s32.totalorder %s1913_s2, %s1339_s30  ;;  %p1346_p0 = scmp.lt.u32.totalorder %s1339_s30, %s1913_s2 }
  0x44   : > { %p1342_p12 = pnand %p1340_p11, %p1623_p8 }
  0x46   : > { %p1343_p13 = pneg %p1342_p12 }
  0x48   : > { %p1348_p2 = pnand %p1346_p0, %p1343_p13 }
  0x4a   : > { %1351 = shalt.err (!%p1348_p2)
}
  0x4b   : > { %s1352_s23 = scalar_lea.vmem %s1613_s26, 512  ;;  %p1360_p4 = scmp.lt.s32.totalorder %s1613_s26, %s1613_s26 }
  0x4c   : > { %p1353_p5 = scmp.ne.s32.totalorder %s1613_s26, %s1352_s23  ;;  %p1361_p10 = scmp.lt.s32.totalorder %s1352_s23, %s1352_s23 }
  0x4e   : > { %p1355_p7 = pnand %p1353_p5, %p1623_p8  ;;  %p1362_p11 = por %p1361_p10, %p1360_p4 }
  0x50   : > { %p1356_p9 = pneg %p1355_p7 }
  0x52   : > { %p1363_p12 = pnand %p1362_p11, %p1356_p9 }
  0x54   : > { %1366 = shalt.err (!%p1363_p12)
}
  0x55   : > { %1213 = dma.hbm_to_vmem [thread:$0]  (!%p1607_p6), %s1913_s2, 512, %s1613_s26, [#allocation7], %s1504_s22, %s1504_s22, %s1505_s25  }
  0x56   : > { %s1506_s27 = smov [#allocation11]   ;;  %s1367_s11 = scalar_lea.hbm %s1918_s7, 512 }
  0x57   : > { %s335_s28 = sshll.u32 %s1506_s27, 4  ;;  %p1368_p13 = scmp.ne.s32.totalorder %s1918_s7, %s1367_s11  ;;  %s336_s28 = int_to_ptr.vmem [resolvable:$true] %s335_s28 }
  0x58   : > { %p1374_p5 = scmp.lt.u32.totalorder %s1367_s11, %s1918_s7 }
  0x59   : > { %p1370_p0 = pnand %p1368_p13, %p1623_p8 }
  0x5b   : > { %p1371_p2 = pneg %p1370_p0 }
  0x5d   : > { %p1376_p7 = pnand %p1374_p5, %p1371_p2 }
  0x5f   : > { %1379 = shalt.err (!%p1376_p7)
}
  0x60   : > { %s1380_s26 = scalar_lea.vmem %s336_s28, 512  ;;  %p1388_p11 = scmp.lt.s32.totalorder %s336_s28, %s336_s28 }
  0x61   : > { %p1381_p9 = scmp.ne.s32.totalorder %s336_s28, %s1380_s26  ;;  %p1389_p12 = scmp.lt.s32.totalorder %s1380_s26, %s1380_s26 }
  0x63   : > { %p1383_p4 = pnand %p1381_p9, %p1623_p8  ;;  %p1390_p1 = por %p1389_p12, %p1388_p11 }
  0x65   : > { %p1384_p10 = pneg %p1383_p4 }
  0x67   : > { %p1391_p3 = pnand %p1390_p1, %p1384_p10 }
  0x69   : > { %1394 = shalt.err (!%p1391_p3)
}
  0x6a   : > { %1219 = dma.hbm_to_vmem [thread:$0]  (!%p1607_p6), %s1918_s7, 512, %s336_s28, [#allocation10], %s1504_s22, %s1504_s22, %s1505_s25  }
  0x6b   : > { %s1054_s24 = sadd.s32 4294967294, %s1499_s18   ;;  %s1722_s12 = sadd.s32 1, %s1499_s18  }
  0x6c   : > { %s33_s27 = ssub.s32 %s1499_s18, %s1722_s12  ;;  %s36_s29 = sadd.s32 1, %s1495_s17 }
  0x6d   : > { %p34_p1 = scmp.eq.s32.totalorder %s33_s27, 0  ;;  %p43_p3 = scmp.ne.s32.totalorder %s1495_s17, %s1491_s16 }
  0x6e   : > { %p44_p8 = scmp.eq.s32.totalorder %s1499_s18, 0  ;;  %p49_p13 = scmp.ne.s32.totalorder %s1491_s16, %s1487_s15 }
  0x6f   : > { %s1733_s30 = scalar_select %p34_p1, %s1495_s17, %s36_s29  }
  0x70   : > { %p1735_p0 = por %p44_p8, %p43_p3  ;;  %p1933_p2 = scmp.eq.s32.totalorder %s1591_s20, 0 }
  0x71   : > { %p262_p5 = scmp.eq.s32.totalorder %s1591_s20, 1  ;;  %p268_p7 = scmp.eq.s32.totalorder %s1054_s24, 1 }
  0x72   : > { %p1741_p6 = por %p1933_p2, %p49_p13  ;;  %p1232_p9 = scmp.lt.s32.totalorder %s1499_s18, 2 }
  0x73   : > { %s355_s25 = sand.u32 1, %s1495_s17   ;;  %p1748_p4 = por %p262_p5, %p43_p3 }
  0x74   : > { %p1752_p10 = por %p268_p7, %p49_p13  ;;  %s1061_s14 = sshll.u32 %s355_s25, 3 }
  0x75   : > { %s1935_s28 = scalar_select %p1748_p4, 1, 0 }
  0x76   : > { %s1936_s13 = scalar_select %p1752_p10, 1, 0 }
  0x77   : > { %s1062_s9 = sshll.u32 %s1499_s18, 7  ;;  %s359_s10 = scalar_lea.vmem [#allocation3], %s1061_s14 }
  0x78   : > { %s1760_s19 = scalar_lea.hbm %s1911_s0, %s1062_s9  ;;  %s366_s24 = sshll.u32 %s359_s10, 4  ;;  %s1762_s24 = int_to_ptr.vmem [resolvable:$true] %s366_s24 }
  0x79   : > { %p1766_p11 = pnand %p1232_p9, %p1735_p0  ;;  %s356_s29 = scalar_lea.sflag [#allocation4], %s355_s25 }
  0x7a   : > { %s1395_s1 = scalar_lea.hbm %s1760_s19, 128  ;;  %s1400_s23 = scalar_lea.hbm %s1911_s0, 256 }
  0x7b   : > { %p1396_p12 = scmp.ne.s32.totalorder %s1760_s19, %s1395_s1  ;;  %p1397_p1 = pneg %p1766_p11 }
  0x7c   : > { %p1401_p13 = scmp.lt.u32.totalorder %s1760_s19, %s1911_s0  ;;  %p1402_p0 = scmp.lt.u32.totalorder %s1400_s23, %s1395_s1 }
  0x7d   : > { %p1398_p3 = pnand %p1397_p1, %p1396_p12  ;;  %p1404_p5 = scmp.lt.u32.totalorder %s1395_s1, %s1760_s19 }
  0x7e   : > { %p1403_p2 = por %p1402_p0, %p1401_p13 }
  0x7f   : > { %p1399_p8 = pneg %p1398_p3 }
  0x80   : > { %p1405_p7 = por %p1404_p5, %p1403_p2 }
  0x82   : > { %p1406_p9 = pnand %p1405_p7, %p1399_p8 }
  0x84   : > { %1409 = shalt.err (!%p1406_p9)
}
  0x85   : > { %s1410_s25 = scalar_lea.vmem %s1762_s24, 128  ;;  %s1507_s10 = smov [#allocation3]  }
  0x86   : > { %p1411_p12 = scmp.ne.s32.totalorder %s1762_s24, %s1410_s25  ;;  %s1415_s14 = sshll.u32 %s1507_s10, 4  ;;  %s1416_s14 = int_to_ptr.vmem [resolvable:$false] %s1415_s14 }
  0x87   : > { %s1417_s9 = scalar_lea.vmem %s1416_s14, 256  ;;  %p1418_p4 = scmp.lt.s32.totalorder %s1762_s24, %s1416_s14 }
  0x88   : > { %p1413_p3 = pnand %p1411_p12, %p1397_p1  ;;  %p1419_p13 = scmp.lt.s32.totalorder %s1417_s9, %s1410_s25 }
  0x8a   : > { %p1414_p10 = pneg %p1413_p3  ;;  %p1420_p0 = por %p1419_p13, %p1418_p4 }
  0x8c   : > { %p1421_p2 = pnand %p1420_p0, %p1414_p10 }
  0x8e   : > { %1424 = shalt.err (!%p1421_p2)
}
  0x8f   : > { %1223 = dma.hbm_to_vmem [thread:$0]  (!%p1766_p11), %s1760_s19, 128, %s1762_s24, %s356_s29  }
  0x90   : > { %p1938_p8 = scmp.ne.s32.totalorder %s1928_s21, 0 }
  0x91   : > { %s1798_s1 = sand.u32 (!%p1938_p8), 1, %s1491_s16  }
  0x92   : > { %375 = sbr.rel (%p1938_p8) target bundleno = 1357 (0x54d), region = 60  ;;  %s1064_s23 = sshll.u32 (!%p1938_p8), %s1798_s1, 3 }
  0x93   : > { %s378_s11 = scalar_lea.sflag (!%p1938_p8), [#allocation4], %s1798_s1  ;;  %s1804_s26 = scalar_lea.vmem (!%p1938_p8), [#allocation3], %s1064_s23 }
  0x99   : > { %1470 = dma.done.wait (%p1741_p6), %s378_s11, 128  }
  0x9a   : > { %1472 = vsyncadd (%p1741_p6), %s378_s11, 4294967168  ;;  %p1939_p4 = scmp.eq.s32.totalorder %s1591_s20, 0 }
  0x9c   : > { %1474 = dma.done.wait (%p1939_p4), [#allocation7], 1024   ;;  %p1940_p10 = pmov %p1939_p4 }
  0x9d   : > { %p1941_p11 = pmov %p1939_p4 }
  0x9e   : > { %1476 = vsyncadd (%p1940_p10), [#allocation7], 4294966272 }
  0x9f   : > { %1478 = dma.done.wait (%p1941_p11), [#allocation10], 1024   ;;  %p1942_p1 = pmov %p1939_p4 }
  0xa0   : > { %v1508_v0 = vmov 0.0|0.0   ;;  %vm1509_vm0 = vmmov 0   ;;  %v1510_v1 = vmov 0.0   ;;  %v520_v2 = vld [vmem:[#allocation8] sm:$0xff]  ;;  %v521_v3 = vld [vmem:[#allocation8 + $0x8] sm:$0xff]  ;;  %v522_v7 = vld [vmem:[#allocation8 + $0x10] sm:$0xff] }
  0xa1   : > { %1480 = vsyncadd (%p1942_p1), [#allocation10], 4294966272  ;;  %1169 = vmatprep.subr.bf16.mxu1 %v1508_v0  ;;  %1163 = vmatprep.subr.bf16.mxu0 %v1508_v0  ;;  %v435_v4 = vld [vmem:[#allocation6] sm:$0xff]  ;;  %v1170_v5 = vpack.c.bf16 %v521_v3, %v520_v2  ;;  %v436_v6 = vld [vmem:[#allocation6 + $0x8] sm:$0xff]  ;;  %vm446_vm1 = vcmask 261120   ;;  %vm758_vm2 = vcmask 64512  }
  0xa2   : > { %1128 = vmatprep.mubr.msk.f32.mxu1 %vm1509_vm0, %v1510_v1  ;;  %1117 = vmatprep.mubr.msk.f32.mxu0 %vm1509_vm0, %v1510_v1  ;;  %v523_v8 = vld [vmem:[#allocation8 + $0x18] sm:$0xff]  ;;  %v1164_v9 = vpack.c.bf16 %v436_v6, %v435_v4  ;;  %v437_v10 = vld [vmem:[#allocation6 + $0x10] sm:$0xff]  ;;  %v601_v23 = vld [vmem:[#allocation9] sm:$0xff]  ;;  %s927_s25 = sld [smem:[#allocation2]]  ;;  %s1082_s9 = sshll.u32 %s1591_s20, 7 }
  0xa3   : > { %v438_v11 = vld [vmem:[#allocation6 + $0x18] sm:$0xff]  ;;  %1171 = vmatpush3.bf16.msra.mxu1 %v1170_v5  ;;  %v1173_v12 = vpack.c.bf16 %v523_v8, %v522_v7  ;;  %v1072_v15 = vld [vmem:[%s1916_s5] ss:$0 sm:$0xff]  ;;  %v602_v24 = vld [vmem:[#allocation9 + $0x8] sm:$0xff]  ;;  %s433_s11 = scalar_lea.vmem [#allocation12], %s1064_s23  ;;  %s1943_s19 = sld [smem:[#allocation18_spill]] }
  0xa4   : > { %1165 = vmatpush3.bf16.msra.mxu0 %v1164_v9  ;;  %1172 = vmatprep.subr.bf16.mxu1 %v1508_v0  ;;  %v1167_v13 = vpack.c.bf16 %v438_v11, %v437_v10  ;;  %v1825_v14 = vld [vmem:[%s1804_s26] sm:$0xff]  ;;  %v1176_v26 = vpack.c.bf16 %v602_v24, %v601_v23  ;;  %v843_v41 = vld [vmem:[#allocation11] sm:$0xff]  ;;  %v844_v42 = vld [vmem:[#allocation11 + $0x8] sm:$0xff]  ;;  %s946_s26 = sshll.u32 %s433_s11, 4  ;;  %s933_s27 = scalar_lea.sflag [#allocation5], %s1798_s1  ;;  %s1868_s26 = int_to_ptr.vmem [resolvable:$true] %s946_s26 }
  0xa5   : > { %1166 = vmatprep.subr.bf16.mxu0 %v1508_v0  ;;  %v1070_v16 = vld [vmem:[%s1915_s4] ss:$0 sm:$0xff]  ;;  %v604_v27 = vld [vmem:[#allocation9 + $0x18] sm:$0xff]  ;;  %v1182_v44 = vpack.c.bf16 %v844_v42, %v843_v41  ;;  %s1425_s20 = scalar_lea.vmem %s1868_s26, 128  ;;  %p1944_p5 = scmp.ne.s32.totalorder %s1935_s28, 0 }
  0xa6   : > { %v603_v25 = vld [vmem:[#allocation9 + $0x10] sm:$0xff]  ;;  %v846_v45 = vld [vmem:[#allocation11 + $0x18] sm:$0xff]  ;;  %p1426_p6 = scmp.ne.s32.totalorder %s1868_s26, %s1425_s20  ;;  %s1511_s23 = smov [#allocation12]  }
  0xa7   : > { %1174 = vmatpush3.bf16.msra.mxu1 %v1173_v12  ;;  %v1179_v28 = vpack.c.bf16 %v604_v27, %v603_v25  ;;  %v1074_v38 = vld [vmem:[%s1917_s6] ss:$0 sm:$0xff]  ;;  %s1429_s29 = sshll.u32 %s1511_s23, 4  ;;  %s1430_s29 = int_to_ptr.vmem [resolvable:$false] %s1429_s29 }
  0xa8   : > { %1168 = vmatpush3.bf16.msra.mxu0 %v1167_v13  ;;  %1142 = vmatprep.subr.mxu1 %v1510_v1  ;;  %v845_v43 = vld [vmem:[#allocation11 + $0x10] sm:$0xff]  ;;  %v928_v54 = vstv %s927_s25  ;;  %p1427_p7 = pnand %p1426_p6, %p1944_p5  ;;  %s1431_s25 = scalar_lea.vmem %s1430_s29, 256 }
  0xa9   : > { %1175 = vmatprep.subr.bf16.mxu0 %v1508_v0  ;;  %v1185_v46 = vpack.c.bf16 %v846_v45, %v845_v43  ;;  %v1079_v52 = vld [vmem:[%s1919_s8] ss:$0 sm:$0xff]  ;;  %s1866_s24 = scalar_lea.hbm %s1943_s19, %s1082_s9  ;;  %p1432_p12 = scmp.lt.s32.totalorder %s1868_s26, %s1430_s29 }
  0xaa   : > { %1129 = vmatmul.mubr.msk.f32.vlgmr.msra.gmra.mrb[0].mxu1 %vm446_vm1, %v1825_v14  ;;  %p1428_p9 = pneg %p1427_p7  ;;  %p1433_p3 = scmp.lt.s32.totalorder %s1431_s25, %s1425_s20 }
  0xab   : > { %1118 = vmatmul.mubr.msk.f32.vlgmr.msra.gmra.mrb[0].mxu0 %vm446_vm1, %v1825_v14  ;;  %1144 = vmatprep.mubr.msk.f32.mxu1 %vm1509_vm0, %v1510_v1 }
  0xac   : > { %1139 = vmatprep.mubr.msk.f32.mxu0 %vm1509_vm0, %v1510_v1  ;;  %1177 = vmatpush3.bf16.msra.mxu0 %v1176_v26  ;;  %p1434_p13 = por %p1433_p3, %p1432_p12 }
  0xad   : > { %1178 = vmatprep.subr.bf16.mxu0 %v1508_v0 }
  0xae   : > { %p1435_p0 = pnand %p1434_p13, %p1428_p9 }
  0xb0   : > { %1180 = vmatpush3.bf16.msra.mxu0 %v1179_v28 }
  0xb1   : > { %1181 = vmatprep.subr.bf16.mxu0 %v1508_v0 }
  0xb3   : > { %1140 = vmatmul.mubr.msk.f32.vlgmr.msra.gmra.mrb[2].mxu0 %vm446_vm1, %v1825_v14 }
  0xb4   : > { %1160 = vmatprep.mubr.msk.f32.mxu0 %vm1509_vm0, %v1510_v1  ;;  %1183 = vmatpush3.bf16.msra.mxu0 %v1182_v44 }
  0xb5   : > { %1184 = vmatprep.subr.bf16.mxu0 %v1508_v0 }
  0xb8   : > { %1186 = vmatpush3.bf16.msra.mxu0 %v1185_v46 }
 0x17d   : > { %v597_v17 = vpop.f32.mrb[0].mxu1 }
 0x17e   : > { %v598_v18 = vadd.f32 %v1072_v15, %v597_v17  ;;  %v1130_v19 = vpop.f32.mrb[1].mxu1  ;;  %v516_v20 = vpop.f32.mrb[0].mxu0 }
 0x17f   : > { %v517_v21 = vadd.f32 %v1070_v16, %v516_v20  ;;  %v1119_v22 = vpop.f32.mrb[1].mxu0 }
 0x180   : > { %1143 = vmatpush3.xpose.msk.msra.mxu1 %vm446_vm1, %v598_v18 }
 0x181   : > { %1147 = vmatprep.subr.mxu1 %v1510_v1 }
 0x183   : > { %1145 = vmatmul.mubr.msk.f32.vlgmr.msra.gmra.mrb[2].mxu1 %vm446_vm1, %v517_v21 }
 0x184   : > { %1149 = vmatprep.mubr.msk.f32.mxu1 %vm1509_vm0, %v1510_v1 }
 0x186   : > { %v678_v37 = vpop.f32.mrb[2].mxu0 }
 0x187   : > { %v1141_v39 = vpop.f32.mrb[3].mxu0  ;;  %v679_v40 = vadd.f32 %v1074_v38, %v678_v37 }
 0x189   : > { %1148 = vmatpush3.msra.mxu1 %v679_v40 }
 0x256   : > { %v754_v29 = vpop.f32.mrb[2].mxu1 }
 0x257   : > { %v1146_v30 = vpop.f32.mrb[3].mxu1  ;;  %v759_v31 = vsel %vm758_vm2, %v754_v29, -inf }
 0x258   : > { %760 = vmax.xlane.f32.xlu0 %v759_v31 }
 0x2e5   : > { %v761_v32 = vpop.xlane.xlu0 %760 }
 0x2e6   : > { %v762_v33 = vsub.f32 %v754_v29, %v761_v32 }
 0x2e8   : > { %v763_v34 = vmul.f32 1.442695, %v762_v33 }
 0x2ea   : > { %1279 = vpow2.f32 %v763_v34 }
 0x2f4   : > { %v1280_v35 = vpop.eup %1279 }
 0x2f5   : > { %v765_v36 = vsel %vm758_vm2, %v1280_v35, 0.0 }
 0x2f6   : > { %766 = vadd.xlane.f32.xlu0 %v765_v36 }
 0x383   : > { %v767_v47 = vpop.xlane.xlu0 %766 }
 0x384   : > { %1281 = vrcp.f32 %v767_v47 }
 0x38e   : > { %v1282_v48 = vpop.eup %1281 }
 0x38f   : > { %v769_v49 = vmul.f32 %v1282_v48, %v1280_v35 }
 0x391   : > { %1150 = vmatmul.mubr.msk.f32.vlgmr.msra.gmra.mrb[4].mxu1 %vm758_vm2, %v769_v49 }
 0x464   : > { %v839_v50 = vpop.f32.mrb[4].mxu1 }
 0x465   : > { %v1151_v51 = vpop.f32.mrb[5].mxu1  ;;  %1161 = vmatmul.mubr.msk.f32.vlgmr.msra.gmra.mrb[4].mxu0 %vm446_vm1, %v839_v50 }
 0x538   : > { %v923_v53 = vpop.f32.mrb[4].mxu0 }
 0x539   : > { %v924_v55 = vadd.f32 %v1079_v52, %v923_v53  ;;  %v1162_v56 = vpop.f32.mrb[5].mxu0 }
 0x53b   : > { %v929_v57 = vmul.f32 %v928_v54, %v924_v55 }
 0x53d   : > { %v930_v58 = vadd.f32 %v929_v57, %v1825_v14 }
 0x53f   : > { %931 = vst.msk [vmem:[%s433_s11] sm:$0xff] %vm446_vm1, %v930_v58 }
 0x540   : > { %1438 = shalt.err (!%p1435_p0)
}
 0x541   : > { %s1439_s1 = scalar_lea.hbm %s1866_s24, 128  ;;  %s1443_s9 = scalar_lea.hbm %s1943_s19, 256 }
 0x542   : > { %p1440_p2 = scmp.ne.s32.totalorder %s1866_s24, %s1439_s1  ;;  %p1444_p10 = scmp.lt.u32.totalorder %s1866_s24, %s1943_s19 }
 0x543   : > { %p1445_p11 = scmp.lt.u32.totalorder %s1443_s9, %s1439_s1  ;;  %p1447_p6 = scmp.lt.u32.totalorder %s1439_s1, %s1866_s24 }
 0x544   : > { %p1441_p8 = pnand %p1440_p2, %p1944_p5 }
 0x545   : > { %p1446_p1 = por %p1445_p11, %p1444_p10 }
 0x546   : > { %p1442_p4 = pneg %p1441_p8 }
 0x547   : > { %p1448_p7 = por %p1447_p6, %p1446_p1 }
 0x549   : > { %p1449_p9 = pnand %p1448_p7, %p1442_p4 }
 0x54b   : > { %1452 = shalt.err (!%p1449_p9)
}
 0x54c   : > { %1205 = dma.vmem_to_hbm [thread:$0]  (%p1944_p5), %s1868_s26, 128, %s1866_s24, %s933_s27  }
 0x54d PF: > { %s958_s22 = sand.u32 1, %s1487_s15   ;;  %p1945_p12 = scmp.ne.s32.totalorder %s1936_s13, 0 }
 0x54e   : > { %p1946_p3 = scmp.ge.s32.totalorder %s1499_s18, 2  ;;  %s959_s20 = scalar_lea.sflag [#allocation5], %s958_s22 }
 0x550   : > { %p1225_p13 = pnand %p1946_p3, %p1945_p12 }
 0x552   : > { %1482 = dma.done.wait (!%p1225_p13), %s959_s20, 128  }
 0x553   : > { %1484 = vsyncadd (!%p1225_p13), %s959_s20, 4294967168  ;;  %p26_p0 = scmp.ge.s32.totalorder %s1722_s12, 4   ;;  %s1947_s15 = smov %s1491_s16 }
 0x554   : > { %s1948_s16 = smov %s1495_s17  ;;  %s1949_s17 = smov %s1733_s30 }
 0x555   : > { %s1950_s18 = smov %s1722_s12  ;;  %28 = sbr.rel (!%p26_p0) target bundleno = 11 (0xb), region = 121 }
 0x55c   :  { %964 = vsyncpa [#allocation4], 1 }
 0x55d   :  { %966 = vsyncpa [#allocation4 + $0x1], 1 }
 0x55e   :  { %967 = vsyncpa [#allocation7], 1 }
 0x55f   :  { %968 = vsyncpa [#allocation10], 1 }
 0x560   :  { %969 = vsyncpa [#allocation5], 1 }
 0x561   :  { %971 = vsyncpa [#allocation5 + $0x1], 1 }

</bundles_post_ra>
